<compile_context>
chip_gen: v5e
topology: v5e:2x2
jax: 0.10.0
libtpu: 0.0.40
codegen_flags: <defaults>
</compile_context>

<pallas_src>
import functools

import jax
import jax.numpy as jnp
from jax import lax
from jax.experimental import pallas as pl
from jax.experimental.pallas import tpu as pltpu

_NEG_BIG = 1e30          # additive mask fill; requires a strictly {0,1} mask
_MiB = 1024 * 1024


def _round_up(x, m):
    return (x + m - 1) // m * m


# ---------------------------------------------------------------------------
# Kernel
# ---------------------------------------------------------------------------
def _splade_max_kernel(h_ref, w_ref, b_ref, nm_ref, o_ref, *,
                       cb, l_pad, n_chunks):
    """One grid step = one vocab tile for the whole (flattened, padded) batch.

    h_ref : (N_pad, D)  flattened hidden states (N_pad = B*L_pad), compute dtype
    w_ref : (D, TV)     MLM head weight tile, compute dtype
    b_ref : (1, TV)     MLM head bias tile, f32
    nm_ref: (N_pad, 1)  additive mask column: 0 (valid) / -1e30 (masked or pad)
    o_ref : (B, TV)     output tile, f32
    """
    tm = cb * l_pad
    tv = o_ref.shape[1]

    def chunk(c):
        if isinstance(c, int):                      # static single-chunk path
            off = c * tm
            row = c * cb
        else:                                       # dynamic fori_loop path
            off = pl.multiple_of(c * tm, 8)
            row = c * cb
            if cb % 8 == 0:
                row = pl.multiple_of(row, 8)
        # (tm, D) x (D, TV) on the MXU, f32 accumulation.
        logits = jnp.dot(h_ref[pl.ds(off, tm), :], w_ref[...],
                         preferred_element_type=jnp.float32)        # (tm, tv)
        # Single VPU op on the big block: additive {0, -1e30} mask.
        masked = logits + nm_ref[pl.ds(off, tm), :]
        # Max over the (padded) sequence positions of each of the cb sequences.
        # l_pad is a multiple of 8 -> layout-preserving reshape.
        mx = jnp.max(masked.reshape(cb, l_pad, tv), axis=1)         # (cb, tv)
        # Deferred bias + relu + log1p on only cb*tv elements.
        o_ref[pl.ds(row, cb), :] = jnp.log1p(
            jnp.maximum(mx + b_ref[...], 0.0)).astype(o_ref.dtype)

    if n_chunks == 1:
        chunk(0)
    else:
        def body(c, carry):
            chunk(c)
            return carry
        lax.fori_loop(0, n_chunks, body, 0)


# ---------------------------------------------------------------------------
# Static configuration helpers
# ---------------------------------------------------------------------------
def _vmem_capacity_bytes():
    try:
        return int(pltpu.get_tpu_info().vmem_capacity_bytes)
    except Exception:
        return 64 * _MiB          # conservative: v7x per-TensorCore VMEM


def _pick_tv(V):
    cands = [c for c in (2048, 1024, 512, 256, 128) if V % c == 0]
    if not cands:
        return V                   # fallback: single full-vocab tile
    for c in cands:                # prefer an even tile count so v7x's two
        if (V // c) % 2 == 0:      # TensorCores get balanced halves
            return c
    return cands[0]


def _pick_cb(B, l_pad):
    # Smallest divisor of B whose chunk (cb * l_pad rows) feeds the 256-wide
    # v6e/v7x MXU with a full M pass; else the whole batch in one chunk.
    for cb in range(1, B + 1):
        if B % cb == 0 and cb * l_pad >= 256:
            return cb
    return B


def _vmem_estimate(n_pad, D, B, tv, cb, l_pad, itemsize, single_buffer, w_bufs):
    h_bufs = 1 if single_buffer else 2
    return (h_bufs * n_pad * D * itemsize            # resident hidden slab
            + h_bufs * n_pad * 128 * 4               # mask column (lane-padded)
            + w_bufs * D * tv * itemsize             # weight tile buffers
            + 2 * 8 * tv * 4                         # bias tile (sublane-pad)
            + 2 * _round_up(B, 8) * tv * 4           # output tile buffers
            + 2 * cb * l_pad * tv * 4)               # per-chunk f32 temporaries


def _pick_config(B, L, D, V, itemsize, tv=None):
    l_pad = _round_up(L, 8)
    n_pad = B * l_pad
    if tv is None:
        tv = _pick_tv(V)
    cb = _pick_cb(B, l_pad)
    cap = _vmem_capacity_bytes()

    # Generation-aware vocab tile: shrink until the working set sits well
    # inside this chip's VMEM (64 MiB/TC on v7x, 128 MiB on v5e/v6e).
    while (tv % 256 == 0
           and _vmem_estimate(n_pad, D, B, tv, cb, l_pad, itemsize,
                              single_buffer=False, w_bufs=3) > 0.55 * cap):
        tv //= 2

    # Weight-tile buffering depth: small N (few flops per weight byte, esp.
    # v5e) benefits from a third buffer; large N is MXU-bound with two.
    w_bufs = 3 if (2 * n_pad / itemsize) < 512 else 2
    w_bufs = min(w_bufs, max(2, V // tv))     # never more buffers than tiles

    def _limit(single_buffer):
        est = _vmem_estimate(n_pad, D, B, tv, cb, l_pad, itemsize,
                             single_buffer, w_bufs)
        return int(max(32 * _MiB,
                       min(int(1.4 * est) + 8 * _MiB, int(0.9 * cap))))

    return dict(tv=tv, cb=cb, l_pad=l_pad, w_bufs=w_bufs,
                limit_single=_limit(True), limit_double=_limit(False))


# ---------------------------------------------------------------------------
# pallas_call wrapper
# ---------------------------------------------------------------------------
@functools.partial(
    jax.jit,
    static_argnames=("tv", "cb", "l_pad", "w_bufs", "use_custom_buffering",
                     "vmem_limit"))
def _splade_impl(hidden, w, b, attention_mask, *, tv, cb, l_pad, w_bufs,
                 use_custom_buffering, vmem_limit):
    B, L, D = hidden.shape
    V = w.shape[1]
    compute_dtype = w.dtype
    itemsize = jnp.dtype(compute_dtype).itemsize

    if l_pad != L:   # pad seq len to a multiple of 8 (pad rows are masked out)
        hidden = jnp.pad(hidden, ((0, 0), (0, l_pad - L), (0, 0)))
        attention_mask = jnp.pad(attention_mask, ((0, 0), (0, l_pad - L)))
    n_pad = B * l_pad
    n_chunks = B // cb

    h_flat = hidden.reshape(n_pad, D).astype(compute_dtype)
    # additive mask column: 0 where attended, -1e30 where masked / padded.
    neg_col = ((attention_mask.astype(jnp.float32) - 1.0) * _NEG_BIG
               ).reshape(n_pad, 1)
    bias2d = b.reshape(1, V).astype(jnp.float32)

    kernel = functools.partial(_splade_max_kernel, cb=cb, l_pad=l_pad,
                               n_chunks=n_chunks)

    h_kwargs, nm_kwargs, w_kwargs = {}, {}, {}
    if use_custom_buffering:
        # Constant-index operands are fetched exactly once across the vocab
        # grid -> single-buffer them; weight tiles get w_bufs-deep pipelining.
        h_kwargs = dict(pipeline_mode=pl.Buffered(1))
        nm_kwargs = dict(pipeline_mode=pl.Buffered(1))
        w_kwargs = dict(pipeline_mode=pl.Buffered(w_bufs))

    in_specs = [
        pl.BlockSpec((n_pad, D), lambda vi: (0, 0), **h_kwargs),   # hidden
        pl.BlockSpec((D, tv), lambda vi: (0, vi), **w_kwargs),     # weight
        pl.BlockSpec((1, tv), lambda vi: (0, vi)),                 # bias
        pl.BlockSpec((n_pad, 1), lambda vi: (0, 0), **nm_kwargs),  # mask col
    ]
    out_spec = pl.BlockSpec((B, tv), lambda vi: (0, vi))

    cost = pl.CostEstimate(
        flops=2 * n_pad * D * V,
        transcendentals=B * V,
        bytes_accessed=(D * V * itemsize + n_pad * D * itemsize
                        + n_pad * 4 + V * 4 + B * V * 4))

    return pl.pallas_call(
        kernel,
        out_shape=jax.ShapeDtypeStruct((B, V), jnp.float32),
        grid_spec=pltpu.PrefetchScalarGridSpec(
            num_scalar_prefetch=0,
            grid=(V // tv,),
            in_specs=in_specs,
            out_specs=out_spec,
        ),
        compiler_params=pltpu.CompilerParams(
            dimension_semantics=("parallel",),
            vmem_limit_bytes=vmem_limit,
        ),
        cost_estimate=cost,
    )(h_flat, w, bias2d, neg_col)


_CUSTOM_BUFFERING_OK = [None]   # None: unknown; decided at first call


def splade_max_pallas(hidden, w, b, attention_mask, *, tv=None):
    """Fused MLM-head projection + splade_max.

    hidden:         (B, L, D) f32 encoder activations
    w:              (D, V)    MLM head weight, ALREADY in the compute dtype
                              (cast once at model init, never per call)
    b:              (V,)      MLM head bias (f32)
    attention_mask: (B, L)    strictly {0,1} — soft masks are NOT supported
                              (bias/relu/log1p are deferred past the max)
    returns:        (B, V)    f32 SPLADE representations
    """
    B, L, D = hidden.shape
    V = w.shape[1]
    cfg = _pick_config(B, L, D, V, jnp.dtype(w.dtype).itemsize, tv)
    assert V % cfg["tv"] == 0
    common = dict(tv=cfg["tv"], cb=cfg["cb"], l_pad=cfg["l_pad"],
                  w_bufs=cfg["w_bufs"])

    if _CUSTOM_BUFFERING_OK[0] is None:
        try:
            out = _splade_impl(hidden, w, b, attention_mask,
                               use_custom_buffering=True,
                               vmem_limit=cfg["limit_single"], **common)
            out = jax.block_until_ready(out)
            _CUSTOM_BUFFERING_OK[0] = True
            return out
        except Exception:
            # pipeline_mode / pl.Buffered not supported by this jax build:
            # fall back to default double-buffering (identical math).
            _CUSTOM_BUFFERING_OK[0] = False

    if _CUSTOM_BUFFERING_OK[0]:
        return _splade_impl(hidden, w, b, attention_mask,
                            use_custom_buffering=True,
                            vmem_limit=cfg["limit_single"], **common)
    return _splade_impl(hidden, w, b, attention_mask,
                        use_custom_buffering=False,
                        vmem_limit=cfg["limit_double"], **common)


# ---------------------------------------------------------------------------
# Model (shared_weights=True, splade_doc=False path of the reference module)
# ---------------------------------------------------------------------------
class SpladeJax:

    def __init__(self, vocab_size, hidden_dim, n_negatives, key,
                 compute_dtype=jnp.bfloat16):
        self.vocab_size = vocab_size
        self.hidden_dim = hidden_dim
        self.n_negatives = n_negatives
        self.compute_dtype = compute_dtype
        k_emb, k_w, k_b = jax.random.split(key, 3)
        # synthetic "encoder": token embedding lookup standing in for BERT body
        self.embed = jax.random.normal(k_emb, (vocab_size, hidden_dim),
                                       jnp.float32) * 0.5
        self.mlm_w = jax.random.normal(k_w, (hidden_dim, vocab_size),
                                       jnp.float32) * 0.1
        self.mlm_b = jax.random.normal(k_b, (vocab_size,), jnp.float32) * 0.1
        # Persist the compute-dtype weight copy ONCE so the per-call forward
        # never re-casts the (D, V) matrix (that cast would cost more HBM
        # traffic than the kernel's own weight stream).
        self.mlm_w_c = self.mlm_w.astype(compute_dtype)

    def encode_hidden(self, input_ids):
        return self.embed[input_ids]                       # (B, L, D)

    def forward(self, input_ids, attention_mask, compute_dtype=None):
        if compute_dtype is None:
            compute_dtype = self.compute_dtype
        w = (self.mlm_w_c if compute_dtype == self.compute_dtype
             else self.mlm_w.astype(compute_dtype))        # f32: no-op astype
        hidden = self.encode_hidden(input_ids)             # (B, L, D)
        representations = splade_max_pallas(
            hidden, w, self.mlm_b, attention_mask)         # (B, V)
        group = self.n_negatives + 2
        output = representations.reshape(-1, group, self.vocab_size)
        return output[:, :1, :], output[:, 1:, :]

    # pure-JAX reference of the same math (for correctness check)
    def forward_ref(self, input_ids, attention_mask):
        hidden = self.encode_hidden(input_ids)
        logits = jnp.einsum("bld,dv->blv", hidden, self.mlm_w) + self.mlm_b
        vals = jnp.log1p(jnp.maximum(logits, 0.0))
        vals = vals * attention_mask.astype(jnp.float32)[:, :, None]
        representations = jnp.max(vals, axis=1)
        group = self.n_negatives + 2
        output = representations.reshape(-1, group, self.vocab_size)
        return output[:, :1, :], output[:, 1:, :]


if __name__ == "__main__":
    key = jax.random.PRNGKey(0)
    k_model, k_ids, k_mask = jax.random.split(key, 3)

    # Small shapes: vocab=256, hidden=32, seq=8, n_negatives=2
    # -> each group = 1 query + (n_negatives+1) docs = 4 sequences, 2 groups.
    VOCAB, HIDDEN, SEQ, N_NEG, GROUPS = 256, 32, 8, 2, 2
    B_TOTAL = GROUPS * (N_NEG + 2)

    model = SpladeJax(VOCAB, HIDDEN, N_NEG, k_model)

    input_ids = jax.random.randint(k_ids, (B_TOTAL, SEQ), 0, VOCAB,
                                   dtype=jnp.int32)
    lens = jax.random.randint(k_mask, (B_TOTAL,), 3, SEQ + 1, dtype=jnp.int32)
    attention_mask = (jnp.arange(SEQ)[None, :] < lens[:, None]).astype(jnp.int32)

    q_ref, d_ref = model.forward_ref(input_ids, attention_mask)

    # f32 compute path: numerically equivalent to the reference (tight tol).
    q32, d32 = model.forward(input_ids, attention_mask,
                             compute_dtype=jnp.float32)
    q32 = jax.block_until_ready(q32)
    d32 = jax.block_until_ready(d32)
    assert q32.shape == (GROUPS, 1, VOCAB)
    assert d32.shape == (GROUPS, N_NEG + 1, VOCAB)
    assert jnp.allclose(q32, q_ref, atol=1e-5, rtol=1e-5)
    assert jnp.allclose(d32, d_ref, atol=1e-5, rtol=1e-5)

    # bf16 compute path (default, native MXU): loosened tolerance vs f32 ref.
    qbf, dbf = model.forward(input_ids, attention_mask)
    qbf = jax.block_until_ready(qbf)
    dbf = jax.block_until_ready(dbf)
    assert qbf.shape == (GROUPS, 1, VOCAB)
    assert dbf.shape == (GROUPS, N_NEG + 1, VOCAB)
    assert jnp.allclose(qbf, q_ref, atol=5e-2, rtol=5e-2)
    assert jnp.allclose(dbf, d_ref, atol=5e-2, rtol=5e-2)

    print("KERNEL_OK")
</pallas_src>

<mosaic_0001>
module attributes {stable_mosaic.version = 11 : i64} {
  func.func @_splade_max_kernel(%arg0: i32, %arg1: memref<64x32xf32, #tpu.memory_space<vmem>>, %arg2: memref<32x128xf32, #tpu.memory_space<vmem>>, %arg3: memref<1x128xf32, #tpu.memory_space<vmem>>, %arg4: memref<64x1xf32, #tpu.memory_space<vmem>>, %arg5: memref<8x128xf32, #tpu.memory_space<vmem>>) attributes {dimension_semantics = [#tpu.dimension_semantics<parallel>], iteration_bounds = array<i64: 2>, scalar_prefetch = 0 : i64, scratch_operands = 0 : i64, tpu.core_type = #tpu.core_type<tc>, window_params = [{pipeline_mode = #tpu.pipeline_mode<synchronous>, transform_indices = @transform_0, window_bounds = array<i64: 64, 32>}, {pipeline_mode = #tpu.pipeline_mode<double_buffered>, transform_indices = @transform_1, window_bounds = array<i64: 32, 128>}, {transform_indices = @transform_2, window_bounds = array<i64: 1, 128>}, {pipeline_mode = #tpu.pipeline_mode<synchronous>, transform_indices = @transform_3, window_bounds = array<i64: 64, 1>}, {transform_indices = @transform_4, window_bounds = array<i64: 8, 128>}]} {
    %c0 = arith.constant 0 : index
    %c0_0 = arith.constant 0 : index
    %0 = vector.load %arg1[%c0, %c0_0] : memref<64x32xf32, #tpu.memory_space<vmem>>, vector<64x32xf32>
    %c0_1 = arith.constant 0 : index
    %c0_2 = arith.constant 0 : index
    %1 = vector.load %arg2[%c0_1, %c0_2] : memref<32x128xf32, #tpu.memory_space<vmem>>, vector<32x128xf32>
    %cst = arith.constant dense<0.000000e+00> : vector<64x128xf32>
    %2 = tpu.matmul %0, %1, %cst {dimension_numbers = #tpu.dot_dimension_numbers<[1], [0], [0], [1], [0, 0, 1, 1], [], []>} : vector<64x32xf32>, vector<32x128xf32>, vector<64x128xf32> -> vector<64x128xf32>
    %c0_3 = arith.constant 0 : index
    %c0_4 = arith.constant 0 : index
    %3 = vector.load %arg4[%c0_3, %c0_4] : memref<64x1xf32, #tpu.memory_space<vmem>>, vector<64x1xf32>
    %4 = vector.broadcast %3 : vector<64x1xf32> to vector<64x128xf32>
    %5 = arith.addf %2, %4 : vector<64x128xf32>
    %6 = vector.shape_cast %5 : vector<64x128xf32> to vector<8x8x128xf32>
    %cst_5 = arith.constant dense<0xFF800000> : vector<8x128xf32>
    %7 = vector.multi_reduction <maximumf>, %6, %cst_5 [1] : vector<8x8x128xf32> to vector<8x128xf32>
    %c0_6 = arith.constant 0 : index
    %c0_7 = arith.constant 0 : index
    %8 = vector.load %arg3[%c0_6, %c0_7] : memref<1x128xf32, #tpu.memory_space<vmem>>, vector<1x128xf32>
    %9 = vector.broadcast %8 : vector<1x128xf32> to vector<8x128xf32>
    %10 = arith.addf %7, %9 : vector<8x128xf32>
    %cst_8 = arith.constant 0.000000e+00 : f32
    %11 = vector.broadcast %cst_8 : f32 to vector<8x128xf32>
    %12 = arith.maximumf %10, %11 : vector<8x128xf32>
    %13 = math.log1p %12 : vector<8x128xf32>
    %c0_9 = arith.constant 0 : index
    %c0_10 = arith.constant 0 : index
    %14 = vector.load %arg5[%c0_9, %c0_10] : memref<8x128xf32, #tpu.memory_space<vmem>>, vector<8x128xf32>
    tpu.vector_store %arg5[%c0_9, %c0_10], %13 {strides = array<i32>} : memref<8x128xf32, #tpu.memory_space<vmem>>, vector<8x128xf32>,
    return
  }
  func.func @transform_0(%arg0: i32) -> (i32, i32) {
    %c0_i32 = arith.constant 0 : i32
    %c0_i32_0 = arith.constant 0 : i32
    %c0_i32_1 = arith.constant 0 : i32
    return %c0_i32, %c0_i32_0 : i32, i32
  }
  func.func @transform_1(%arg0: i32) -> (i32, i32) {
    %c0_i32 = arith.constant 0 : i32
    %c0_i32_0 = arith.constant 0 : i32
    return %c0_i32, %arg0 : i32, i32
  }
  func.func @transform_2(%arg0: i32) -> (i32, i32) {
    %c0_i32 = arith.constant 0 : i32
    %c0_i32_0 = arith.constant 0 : i32
    return %c0_i32, %arg0 : i32, i32
  }
  func.func @transform_3(%arg0: i32) -> (i32, i32) {
    %c0_i32 = arith.constant 0 : i32
    %c0_i32_0 = arith.constant 0 : i32
    %c0_i32_1 = arith.constant 0 : i32
    return %c0_i32, %c0_i32_0 : i32, i32
  }
  func.func @transform_4(%arg0: i32) -> (i32, i32) {
    %c0_i32 = arith.constant 0 : i32
    %c0_i32_0 = arith.constant 0 : i32
    return %c0_i32, %arg0 : i32, i32
  }
}

module attributes {stable_mosaic.version = 11 : i64} {
  func.func @_splade_max_kernel(%arg0: i32, %arg1: memref<64x32xf32, #tpu.memory_space<vmem>>, %arg2: memref<32x128xf32, #tpu.memory_space<vmem>>, %arg3: memref<1x128xf32, #tpu.memory_space<vmem>>, %arg4: memref<64x1xf32, #tpu.memory_space<vmem>>, %arg5: memref<8x128xf32, #tpu.memory_space<vmem>>) attributes {dimension_semantics = [#tpu.dimension_semantics<parallel>], iteration_bounds = array<i64: 2>, scalar_prefetch = 0 : i64, scratch_operands = 0 : i64, tpu.core_type = #tpu.core_type<tc>, window_params = [{pipeline_mode = #tpu.pipeline_mode<synchronous>, transform_indices = @transform_0, window_bounds = array<i64: 64, 32>}, {transform_indices = @transform_1, window_bounds = array<i64: 32, 128>}, {transform_indices = @transform_2, window_bounds = array<i64: 1, 128>}, {pipeline_mode = #tpu.pipeline_mode<synchronous>, transform_indices = @transform_3, window_bounds = array<i64: 64, 1>}, {transform_indices = @transform_4, window_bounds = array<i64: 8, 128>}]} {
    %c0 = arith.constant 0 : index
    %c0_0 = arith.constant 0 : index
    %0 = vector.load %arg1[%c0, %c0_0] : memref<64x32xf32, #tpu.memory_space<vmem>>, vector<64x32xf32>
    %c0_1 = arith.constant 0 : index
    %c0_2 = arith.constant 0 : index
    %1 = vector.load %arg2[%c0_1, %c0_2] : memref<32x128xf32, #tpu.memory_space<vmem>>, vector<32x128xf32>
    %cst = arith.constant dense<0.000000e+00> : vector<64x128xf32>
    %2 = tpu.matmul %0, %1, %cst {dimension_numbers = #tpu.dot_dimension_numbers<[1], [0], [0], [1], [0, 0, 1, 1], [], []>} : vector<64x32xf32>, vector<32x128xf32>, vector<64x128xf32> -> vector<64x128xf32>
    %c0_3 = arith.constant 0 : index
    %c0_4 = arith.constant 0 : index
    %3 = vector.load %arg4[%c0_3, %c0_4] : memref<64x1xf32, #tpu.memory_space<vmem>>, vector<64x1xf32>
    %4 = vector.broadcast %3 : vector<64x1xf32> to vector<64x128xf32>
    %5 = arith.addf %2, %4 : vector<64x128xf32>
    %6 = vector.shape_cast %5 : vector<64x128xf32> to vector<8x8x128xf32>
    %cst_5 = arith.constant dense<0xFF800000> : vector<8x128xf32>
    %7 = vector.multi_reduction <maximumf>, %6, %cst_5 [1] : vector<8x8x128xf32> to vector<8x128xf32>
    %c0_6 = arith.constant 0 : index
    %c0_7 = arith.constant 0 : index
    %8 = vector.load %arg3[%c0_6, %c0_7] : memref<1x128xf32, #tpu.memory_space<vmem>>, vector<1x128xf32>
    %9 = vector.broadcast %8 : vector<1x128xf32> to vector<8x128xf32>
    %10 = arith.addf %7, %9 : vector<8x128xf32>
    %cst_8 = arith.constant 0.000000e+00 : f32
    %11 = vector.broadcast %cst_8 : f32 to vector<8x128xf32>
    %12 = arith.maximumf %10, %11 : vector<8x128xf32>
    %13 = math.log1p %12 : vector<8x128xf32>
    %c0_9 = arith.constant 0 : index
    %c0_10 = arith.constant 0 : index
    %14 = vector.load %arg5[%c0_9, %c0_10] : memref<8x128xf32, #tpu.memory_space<vmem>>, vector<8x128xf32>
    tpu.vector_store %arg5[%c0_9, %c0_10], %13 {strides = array<i32>} : memref<8x128xf32, #tpu.memory_space<vmem>>, vector<8x128xf32>,
    return
  }
  func.func @transform_0(%arg0: i32) -> (i32, i32) {
    %c0_i32 = arith.constant 0 : i32
    %c0_i32_0 = arith.constant 0 : i32
    %c0_i32_1 = arith.constant 0 : i32
    return %c0_i32, %c0_i32_0 : i32, i32
  }
  func.func @transform_1(%arg0: i32) -> (i32, i32) {
    %c0_i32 = arith.constant 0 : i32
    %c0_i32_0 = arith.constant 0 : i32
    return %c0_i32, %arg0 : i32, i32
  }
  func.func @transform_2(%arg0: i32) -> (i32, i32) {
    %c0_i32 = arith.constant 0 : i32
    %c0_i32_0 = arith.constant 0 : i32
    return %c0_i32, %arg0 : i32, i32
  }
  func.func @transform_3(%arg0: i32) -> (i32, i32) {
    %c0_i32 = arith.constant 0 : i32
    %c0_i32_0 = arith.constant 0 : i32
    %c0_i32_1 = arith.constant 0 : i32
    return %c0_i32, %c0_i32_0 : i32, i32
  }
  func.func @transform_4(%arg0: i32) -> (i32, i32) {
    %c0_i32 = arith.constant 0 : i32
    %c0_i32_0 = arith.constant 0 : i32
    return %c0_i32, %arg0 : i32, i32
  }
}

</mosaic_0001>

<bundles_post_ra>
// kernel: _splade_impl.1
= control target key start
LH: loop header
LB: loop body
LE: loop exit
PB: predicated region body
PF: predicated region fallthrough
CT: control target
= control target key end

     0   :  { %9 = vsyncpa [#allocation3], 0  ;;  %s1099_s0 = inlined_call_operand.vmem [shape: f32[64,32], index: 0, kind: input, shape index: {}]   ;;  %s1100_s1 = inlined_call_operand.hbm [shape: f32[32,256], index: 1, kind: input, shape index: {}]   ;;  %s1101_s2 = inlined_call_operand.vmem [shape: f32[1,256], index: 2, kind: input, shape index: {}]   ;;  %s1102_s3 = inlined_call_operand.vmem [shape: f32[64,1], index: 3, kind: input, shape index: {}]   ;;  %s1103_s4 = inlined_call_operand.hbm [shape: f32[8,256], index: 4, kind: output, shape index: {}]  }
   0x1   :  { %11 = vsyncpa [#allocation3 + $0x1], 0 }
   0x2   :  { %12 = vsyncpa [#allocation4], 0 }
   0x3   :  { %14 = vsyncpa [#allocation4 + $0x1], 0  ;;  %s852_s15 = smov 0   ;;  %s854_s16 = smov 0  }
   0x4   :  { %s856_s17 = smov 0   ;;  %s858_s18 = smov 0  }
   0x5 LB: > { %s873_s19 = sadd.s32 4294967295, %s821_s18   ;;  %s623_s20 = sadd.s32 4294967294, %s821_s18   ;;  %s821_s18 = sphi %s858_s18, %s1122_s18   ;;  %s817_s17 = sphi %s856_s17, %s1121_s17   ;;  %s813_s16 = sphi %s854_s16, %s1120_s16   ;;  %s809_s15 = sphi %s852_s15, %s1119_s15  }
   0x6   : > { %s877_s21 = sadd.s32 1, %s821_s18   ;;  %s48_s22 = sadd.s32 1, %s817_s17 }
   0x7   : > { %s45_s23 = ssub.s32 %s821_s18, %s877_s21  ;;  %p55_p0 = scmp.ne.s32.totalorder %s817_s17, %s813_s16 }
   0x8   : > { %p46_p1 = scmp.eq.s32.totalorder %s45_s23, 0  ;;  %p56_p2 = scmp.eq.s32.totalorder %s821_s18, 0 }
   0x9   : > { %p61_p3 = scmp.ne.s32.totalorder %s813_s16, %s809_s15  ;;  %p62_p4 = scmp.eq.s32.totalorder %s873_s19, 0 }
   0xa   : > { %s889_s24 = scalar_select %p46_p1, %s817_s17, %s48_s22  }
   0xb   : > { %p891_p5 = por %p56_p2, %p55_p0  ;;  %p895_p6 = por %p62_p4, %p61_p3 }
   0xc   : > { %p132_p7 = scmp.eq.s32.totalorder %s873_s19, 1  ;;  %p138_p8 = scmp.eq.s32.totalorder %s623_s20, 1 }
   0xd   : > { %p625_p9 = scmp.ge.s32.totalorder %s821_s18, 2  ;;  %p667_p10 = scmp.lt.s32.totalorder %s821_s18, 2 }
   0xe   : > { %p902_p11 = por %p132_p7, %p55_p0  ;;  %p906_p12 = por %p138_p8, %p61_p3 }
   0xf   : > { %s164_s29 = sand.u32 1, %s817_s17   ;;  %s627_s30 = sshll.u32 %s821_s18, 3 }
  0x10   : > { %s626_s5 = sshll.u32 %s164_s29, 5  ;;  %s172_s8 = scalar_lea.hbm %s1100_s1, %s627_s30 }
  0x11   : > { %s173_s9 = sshll.u32 %s172_s8, 4  ;;  %s168_s10 = scalar_lea.vmem [#allocation2], %s626_s5  ;;  %s174_s9 = int_to_ptr.hbm [resolvable:$true] %s173_s9 }
  0x12   : > { %s175_s11 = sshll.u32 %s168_s10, 4  ;;  %p917_p13 = pnand %p667_p10, %p891_p5  ;;  %s176_s11 = int_to_ptr.vmem [resolvable:$true] %s175_s11 }
  0x13   : > { %p628_p0 = scmp.ge.s32.totalorder %s821_s18, 1  ;;  %s165_s13 = scalar_lea.sflag [#allocation3], %s164_s29 }
  0x14   : > { %s725_s14 = sshra.s32 %s174_s9, 4  ;;  %p729_p2 = pneg %p917_p13  ;;  %s726_s14 = int_to_ptr.hbm [resolvable:$true] %s725_s14 }
  0x15   : > { %s727_s20 = scalar_lea.hbm %s726_s14, 32  ;;  %s732_s30 = scalar_lea.hbm %s1100_s1, 64 }
  0x16   : > { %p728_p1 = scmp.ne.s32.totalorder %s726_s14, %s727_s20  ;;  %p733_p5 = scmp.lt.s32.totalorder %s726_s14, %s1100_s1 }
  0x17   : > { %p734_p7 = scmp.lt.s32.totalorder %s732_s30, %s727_s20 }
  0x18   : > { %p730_p3 = pnand %p729_p2, %p728_p1 }
  0x19   : > { %p735_p8 = por %p734_p7, %p733_p5 }
  0x1a   : > { %p731_p4 = pneg %p730_p3 }
  0x1c   : > { %p736_p10 = pnand %p735_p8, %p731_p4 }
  0x1e   : > { %739 = shalt.err (!%p736_p10)
}
  0x1f   : > { %s823_s29 = smov 256   ;;  %s824_s6 = smov 128  }
  0x20   : > { %s825_s7 = smov 8   ;;  %p189_p1 = scmp.lt.s32.totalorder %s821_s18, 3 }
  0x21   : > { %662 = dma.hbm_to_vmem [thread:$0]  (!%p917_p13), %s174_s9, 512, %s176_s11, %s165_s13, %s823_s29, %s824_s6, %s825_s7  }
  0x22   : > { %p190_p2 = pnand %p628_p0, %p189_p1 }
  0x23   : > { %s936_s8 = sand.u32 (!%p190_p2), 1, %s813_s16  }
  0x24   : > { %193 = sbr.rel (%p190_p2) target bundleno = 235 (0xeb), region = 36  ;;  %s629_s10 = sshll.u32 (!%p190_p2), %s936_s8, 5 }
  0x25   : > { %s196_s14 = scalar_lea.sflag (!%p190_p2), [#allocation3], %s936_s8  ;;  %s199_s20 = scalar_lea.vmem (!%p190_p2), [#allocation2], %s629_s10 }
  0x29   : > { %800 = dma.done.wait (%p895_p6), %s196_s14, 512  }
  0x2a   : > { %802 = vsyncadd (%p895_p6), %s196_s14, 4294966784  ;;  %v826_v0 = vmov 0   ;;  %v242_v1 = vld [vmem:[%s199_s20 + $0x18] sm:$0xff]  ;;  %v244_v2 = vld [vmem:[%s1102_s3 + $0x8] sm:$0xff]  ;;  %p228_p6 = scmp.lt.s32.totalorder %s873_s19, 1  ;;  %vm291_vm0 = vcmask 261120  }
  0x2b   : > { %705 = vset.pattern.permute.xlu0 %v826_v0  ;;  %706 = vset.pattern.permute.xlu1 %v826_v0  ;;  %v243_v3 = vld [vmem:[%s1102_s3] sm:$0xff]  ;;  %v241_v4 = vld [vmem:[%s199_s20 + $0x10] sm:$0xff]  ;;  %v240_v5 = vld [vmem:[%s199_s20 + $0x8] sm:$0xff]  ;;  %vm506_vm4 = vcmask 1041409   ;;  %vm509_vm6 = vcmask 1042434   ;;  %vm512_vm8 = vcmask 1043459  }
  0x2c   : > { %707 = vset.pattern.permute.xlu2 %v826_v0  ;;  %328 = vmatpush.msra.mxu0 %v242_v1  ;;  %v239_v6 = vld [vmem:[%s199_s20] sm:$0xff]  ;;  %v233_v8 = vld [vmem:[%s1099_s0 + $0x10] sm:$0xff]  ;;  %s964_s7 = scalar_select %p228_p6, %s873_s19, 1  ;;  %v246_v12 = vld [vmem:[%s1102_s3 + $0x18] sm:$0xff]  ;;  %vm515_vm10 = vcmask 1044484   ;;  %vm518_vm12 = vcmask 1045509  }
  0x2d   : > { %643 = vmatpush.msra.mxu1 %v242_v1  ;;  %644 = vmatpush.msra.mxu2 %v242_v1  ;;  %v231_v7 = vld [vmem:[%s1099_s0] sm:$0xff]  ;;  %v237_v10 = vld [vmem:[%s1099_s0 + $0x30] sm:$0xff]  ;;  %v232_v14 = vld [vmem:[%s1099_s0 + $0x8] sm:$0xff]  ;;  %vm521_vm13 = vcmask 1046534   ;;  %vm524_vm15 = vcmask 1047559   ;;  %s529_s14 = scalar_lea.sflag [#allocation4], %s936_s8 }
  0x2e   : > { %645 = vmatpush.msra.mxu3 %v242_v1  ;;  %258 = vperm.xlu0 %705, %v244_v2   ;;  %v235_v9 = vld [vmem:[%s1099_s0 + $0x20] sm:$0xff]  ;;  %v245_v11 = vld [vmem:[%s1102_s3 + $0x10] sm:$0xff]  ;;  %s230_s22 = scalar_lea.vmem %s1101_s2, %s964_s7  ;;  %v234_v15 = vld [vmem:[%s1099_s0 + $0x18] sm:$0xff]  ;;  %s630_s7 = sshll.u32 %s936_s8, 3 }
  0x2f   : > { %253 = vperm.xlu1 %706, %v243_v3   ;;  %329 = vmatpush.msra.mxu0 %v241_v4  ;;  %v247_v13 = vld [vmem:[%s1102_s3 + $0x20] sm:$0xff]  ;;  %v236_v16 = vld [vmem:[%s1099_s0 + $0x28] sm:$0xff]  ;;  %v238_v17 = vld [vmem:[%s1099_s0 + $0x38] sm:$0xff]  ;;  %s775_s13 = scalar_lea.hbm %s1103_s4, 16 }
  0x30   : > { %646 = vmatpush.msra.mxu1 %v241_v4  ;;  %647 = vmatpush.msra.mxu2 %v241_v4  ;;  %v249_v18 = vld [vmem:[%s1102_s3 + $0x30] sm:$0xff]  ;;  %v250_v19 = vld [vmem:[%s1102_s3 + $0x38] sm:$0xff]  ;;  %v248_v20 = vld [vmem:[%s1102_s3 + $0x28] sm:$0xff] }
  0x31   : > { %648 = vmatpush.msra.mxu3 %v241_v4  ;;  %330 = vmatpush.msra.mxu0 %v240_v5  ;;  %v1013_v57 = vld [vmem:[%s230_s22] ss:$0 sm:$0xff]  ;;  %s640_s22 = sshll.u32 %s873_s19, 3  ;;  %s227_s19 = scalar_lea.vmem [#allocation5], %s630_s7 }
  0x32   : > { %649 = vmatpush.msra.mxu1 %v240_v5  ;;  %650 = vmatpush.msra.mxu2 %v240_v5  ;;  %s539_s29 = scalar_lea.hbm %s1103_s4, %s640_s22  ;;  %s541_s6 = sshll.u32 %s227_s19, 4  ;;  %s542_s6 = int_to_ptr.vmem [resolvable:$true] %s541_s6 }
  0x33   : > { %651 = vmatpush.msra.mxu3 %v240_v5  ;;  %331 = vmatpush.msra.mxu0 %v239_v6  ;;  %s543_s10 = sshll.u32 %s539_s29, 4  ;;  %s544_s10 = int_to_ptr.hbm [resolvable:$true] %s543_s10 }
  0x34   : > { %652 = vmatpush.msra.mxu1 %v239_v6  ;;  %653 = vmatpush.msra.mxu2 %v239_v6  ;;  %s769_s20 = sshra.s32 %s544_s10, 4  ;;  %s770_s20 = int_to_ptr.hbm [resolvable:$true] %s769_s20 }
  0x35   : > { %654 = vmatpush.msra.mxu3 %v239_v6  ;;  %631 = vmatmul.msk.f32.vlgmr.msra.gmra.mxu0 %vm291_vm0, %v231_v7  ;;  %s771_s9 = scalar_lea.hbm %s770_s20, 8  ;;  %p776_p4 = scmp.lt.s32.totalorder %s770_s20, %s1103_s4 }
  0x36   : > { %633 = vmatmul.msk.f32.vlgmr.msra.gmra.mxu1 %vm291_vm0, %v233_v8  ;;  %635 = vmatmul.msk.f32.vlgmr.msra.gmra.mxu2 %vm291_vm0, %v235_v9  ;;  %p772_p13 = scmp.ne.s32.totalorder %s770_s20, %s771_s9  ;;  %p777_p5 = scmp.lt.s32.totalorder %s775_s13, %s771_s9 }
  0x37   : > { %637 = vmatmul.msk.f32.vlgmr.msra.gmra.mxu3 %vm291_vm0, %v237_v10  ;;  %263 = vperm.xlu0 %705, %v245_v11  }
  0x38   : > { %268 = vperm.xlu1 %706, %v246_v12   ;;  %273 = vperm.xlu2 %707, %v247_v13   ;;  %p773_p0 = pnand %p772_p13, %p902_p11  ;;  %p778_p7 = por %p777_p5, %p776_p4 }
  0x3a   : > { %p774_p3 = pneg %p773_p0 }
  0x3c   : > { %p779_p8 = pnand %p778_p7, %p774_p3 }
  0x3d   : > { %632 = vmatmul.msk.f32.gmra.mxu0 %vm291_vm0, %v232_v14 }
  0x3e   : > { %634 = vmatmul.msk.f32.gmra.mxu1 %vm291_vm0, %v234_v15  ;;  %636 = vmatmul.msk.f32.gmra.mxu2 %vm291_vm0, %v236_v16 }
  0x3f   : > { %638 = vmatmul.msk.f32.gmra.mxu3 %vm291_vm0, %v238_v17  ;;  %283 = vperm.xlu0 %705, %v249_v18  }
  0x40   : > { %288 = vperm.xlu1 %706, %v250_v19   ;;  %278 = vperm.xlu2 %707, %v248_v20  }
  0x92   : > { %v274_v30 = vpop.permute.xlu2 %273 }
  0x9a   : > { %v279_v61 = vpop.permute.xlu2 %278 }
  0xa0   : > { %v259_v21 = vpop.permute.xlu0 %258 }
  0xa1   : > { %v254_v22 = vpop.permute.xlu1 %253 }
  0xa9   : > { %v264_v23 = vpop.permute.xlu0 %263 }
  0xaa   : > { %v269_v33 = vpop.permute.xlu1 %268 }
  0xb1   : > { %v284_v34 = vpop.permute.xlu0 %283 }
  0xb2   : > { %v333_v24 = vpop.f32.mrf.mxu0  ;;  %v289_v10 = vpop.permute.xlu1 %288 }
  0xb3   : > { %v339_v25 = vpop.f32.mrf.mxu1  ;;  %v334_v26 = vadd.f32 %v333_v24, %v254_v22 }
  0xb4   : > { %v340_v27 = vadd.f32 %v339_v25, %v264_v23 }
  0xb5   : > { %v357_v28 = vrot.slane %v334_v26, 4 }
  0xb6   : > { %v369_v29 = vrot.slane %v340_v27, 4 }
  0xb7   : > { %v358_v31 = vmax.f32 %v334_v26, %v357_v28 }
  0xb8   : > { %v370_v32 = vmax.f32 %v340_v27, %v369_v29 }
  0xb9   : > { %v359_v35 = vrot.slane %v358_v31, 2  ;;  %v345_v37 = vpop.f32.mrf.mxu2 }
  0xba   : > { %v371_v36 = vrot.slane %v370_v32, 2  ;;  %v351_v38 = vpop.f32.mrf.mxu3  ;;  %v346_v39 = vadd.f32 %v345_v37, %v274_v30  ;;  %v336_v41 = vpop.f32.mrf.mxu0 }
  0xbb   : > { %v352_v40 = vadd.f32 %v351_v38, %v284_v34  ;;  %v342_v42 = vpop.f32.mrf.mxu1  ;;  %v360_v43 = vmax.f32 %v358_v31, %v359_v35  ;;  %v337_v45 = vadd.f32 %v336_v41, %v259_v21 }
  0xbc   : > { %v372_v44 = vmax.f32 %v370_v32, %v371_v36  ;;  %v343_v46 = vadd.f32 %v342_v42, %v269_v33  ;;  %v381_v47 = vrot.slane %v346_v39, 4 }
  0xbd   : > { %v393_v48 = vrot.slane %v352_v40, 4  ;;  %v363_v50 = vrot.slane %v337_v45, 4  ;;  %v361_v52 = vrot.slane %v360_v43, 1 }
  0xbe   : > { %v373_v49 = vrot.slane %v372_v44, 1  ;;  %v375_v51 = vrot.slane %v343_v46, 4  ;;  %v382_v53 = vmax.f32 %v346_v39, %v381_v47 }
  0xbf   : > { %v394_v54 = vmax.f32 %v352_v40, %v393_v48  ;;  %v364_v55 = vmax.f32 %v337_v45, %v363_v50  ;;  %v362_v1 = vmax.f32 %v360_v43, %v361_v52 }
  0xc0   : > { %v376_v56 = vmax.f32 %v343_v46, %v375_v51  ;;  %v374_v58 = vmax.f32 %v372_v44, %v373_v49  ;;  %v383_v59 = vrot.slane %v382_v53, 2 }
  0xc1   : > { %v395_v60 = vrot.slane %v394_v54, 2  ;;  %v365_v62 = vrot.slane %v364_v55, 2  ;;  %v348_v0 = vpop.f32.mrf.mxu2  ;;  %v409_v11 = vadd.f32 %v1013_v57, %v362_v1 }
  0xc2   : > { %v377_v63 = vrot.slane %v376_v56, 2  ;;  %v384_v2 = vmax.f32 %v382_v53, %v383_v59  ;;  %v349_v4 = vadd.f32 %v348_v0, %v279_v61  ;;  %v411_v6 = vadd.f32 %v1013_v57, %v374_v58  ;;  %v354_v8 = vpop.f32.mrf.mxu3 }
  0xc3   : > { %v396_v3 = vmax.f32 %v394_v54, %v395_v60  ;;  %v366_v5 = vmax.f32 %v364_v55, %v365_v62  ;;  %v355_v16 = vadd.f32 %v354_v8, %v289_v10  ;;  %v417_v20 = vmax.f32 %v409_v11, 0.0 }
  0xc4   : > { %v385_v7 = vrot.slane %v384_v2, 1  ;;  %v378_v9 = vmax.f32 %v376_v56, %v377_v63  ;;  %v387_v14 = vrot.slane %v349_v4, 4  ;;  %v419_v17 = vmax.f32 %v411_v6, 0.0 }
  0xc5   : > { %v397_v13 = vrot.slane %v396_v3, 1  ;;  %v367_v15 = vrot.slane %v366_v5, 1  ;;  %v399_v25 = vrot.slane %v355_v16, 4  ;;  %v425_v29 = vadd.f32 1.0, %v417_v20 }
  0xc6   : > { %v386_v12 = vmax.f32 %v384_v2, %v385_v7  ;;  %v379_v19 = vrot.slane %v378_v9, 1  ;;  %v388_v23 = vmax.f32 %v349_v4, %v387_v14  ;;  %v443_v26 = vadd.f32 1.0, %v419_v17 }
  0xc7   : > { %v368_v18 = vmax.f32 %v366_v5, %v367_v15  ;;  %v398_v22 = vmax.f32 %v396_v3, %v397_v13  ;;  %v400_v34 = vmax.f32 %v355_v16, %v399_v25  ;;  %v428_v36 = vmul.f32 -0.5, %v417_v20 }
  0xc8   : > { %v413_v21 = vadd.f32 %v1013_v57, %v386_v12  ;;  %v380_v28 = vmax.f32 %v378_v9, %v379_v19  ;;  %v389_v32 = vrot.slane %v388_v23, 2  ;;  %709 = vlog2.f32 %v443_v26 }
  0xc9   : > { %v410_v24 = vadd.f32 %v1013_v57, %v368_v18  ;;  %v415_v31 = vadd.f32 %v1013_v57, %v398_v22  ;;  %v431_v37 = vand.u32 2147483647, %v417_v20  ;;  %v446_v42 = vmul.f32 -0.5, %v419_v17 }
  0xca   : > { %v1019_v30 = vmax.f32 %v413_v21, 0.0  ;;  %v412_v38 = vadd.f32 %v1013_v57, %v380_v28  ;;  %v390_v41 = vmax.f32 %v388_v23, %v389_v32  ;;  %v449_v43 = vand.u32 2147483647, %v419_v17 }
  0xcb   : > { %v418_v27 = vmax.f32 %v410_v24, 0.0  ;;  %v1024_v40 = vmax.f32 %v415_v31, 0.0  ;;  %v401_v45 = vrot.slane %v400_v34, 2  ;;  %v429_v48 = vadd.f32 1.0, %v428_v36 }
  0xcc   : > { %v461_v39 = vadd.f32 1.0, %v1019_v30  ;;  %v420_v44 = vmax.f32 %v412_v38, 0.0  ;;  %v391_v47 = vrot.slane %v390_v41, 1  ;;  %vm1026_vm1 = vcmp.lt.f32.partialorder %v431_v37, 0.0004427343 }
  0xcd   : > { %v434_v33 = vadd.f32 1.0, %v418_v27  ;;  %v437_v35 = vmul.f32 -0.5, %v418_v27  ;;  %v440_v49 = vand.u32 2147483647, %v418_v27  ;;  %v479_v53 = vadd.f32 1.0, %v1024_v40 }
  0xce   : > { %v452_v50 = vadd.f32 1.0, %v420_v44  ;;  %v710_v51 = vpop.eup %709  ;;  %v392_v54 = vmax.f32 %v390_v41, %v391_v47  ;;  %v402_v55 = vmax.f32 %v400_v34, %v401_v45  ;;  %v447_v58 = vadd.f32 1.0, %v446_v42 }
  0xcf   : > { %711 = vlog2.f32 %v434_v33  ;;  %v438_v46 = vadd.f32 1.0, %v437_v35  ;;  %vm1031_vm2 = vcmp.lt.f32.partialorder %v449_v43, 0.0004427343  ;;  %v455_v60 = vmul.f32 -0.5, %v420_v44 }
  0xd0   : > { %713 = vlog2.f32 %v425_v29  ;;  %v414_v0 = vadd.f32 %v1013_v57, %v392_v54  ;;  %v403_v1 = vrot.slane %v402_v55, 1  ;;  %v430_v2 = vmul.f32 %v429_v48, %v417_v20 }
  0xd1   : > { %715 = vlog2.f32 %v461_v39  ;;  %v439_v63 = vmul.f32 %v438_v46, %v418_v27  ;;  %v445_v3 = vmul.f32 0.6931472, %v710_v51  ;;  %v464_v4 = vmul.f32 -0.5, %v1019_v30 }
  0xd2   : > { %717 = vlog2.f32 %v452_v50  ;;  %vm441_vm3 = vcmp.lt.f32.partialorder %v440_v49, 0.0004427343  ;;  %v422_v6 = vmax.f32 %v414_v0, 0.0  ;;  %v404_v7 = vmax.f32 %v402_v55, %v403_v1 }
  0xd3   : > { %719 = vlog2.f32 %v479_v53  ;;  %v448_v9 = vmul.f32 %v447_v58, %v419_v17  ;;  %v482_v10 = vmul.f32 -0.5, %v1024_v40  ;;  %v456_v11 = vadd.f32 1.0, %v455_v60 }
  0xd4   : > { %v458_v14 = vand.u32 2147483647, %v420_v44  ;;  %v470_v15 = vadd.f32 1.0, %v422_v6  ;;  %v416_v16 = vadd.f32 %v1013_v57, %v404_v7  ;;  %v467_v19 = vand.u32 2147483647, %v1019_v30 }
  0xd5   : > { %v712_v56 = vpop.eup %711  ;;  %v485_v20 = vand.u32 2147483647, %v1024_v40  ;;  %v473_v21 = vmul.f32 -0.5, %v422_v6  ;;  %v451_v22 = vsel %vm1031_vm2, %v448_v9, %v445_v3  ;;  %v465_v17 = vadd.f32 1.0, %v464_v4 }
  0xd6   : > { %v714_v61 = vpop.eup %713  ;;  %v436_v62 = vmul.f32 0.6931472, %v712_v56  ;;  %721 = vlog2.f32 %v470_v15  ;;  %v483_v25 = vadd.f32 1.0, %v482_v10  ;;  %v457_v26 = vmul.f32 %v456_v11, %v420_v44 }
  0xd7   : > { %v427_v8 = vmul.f32 0.6931472, %v714_v61  ;;  %v716_v12 = vpop.eup %715  ;;  %v424_v27 = vmax.f32 %v416_v16, 0.0  ;;  %vm1045_vm5 = vcmp.lt.f32.partialorder %v458_v14, 0.0004427343  ;;  %v508_v32 = vrot.slane %v451_v22, 6 }
  0xd8   : > { %v442_v5 = vsel %vm441_vm3, %v439_v63, %v436_v62  ;;  %v718_v18 = vpop.eup %717  ;;  %v463_v28 = vmul.f32 0.6931472, %v716_v12  ;;  %v474_v34 = vadd.f32 1.0, %v473_v21  ;;  %v466_v36 = vmul.f32 %v465_v17, %v1019_v30 }
  0xd9   : > { %v505_v13 = vrot.slane %v442_v5, 7  ;;  %v454_v23 = vmul.f32 0.6931472, %v718_v18  ;;  %v433_v24 = vsel %vm1026_vm1, %v430_v2, %v427_v8  ;;  %v720_v57 = vpop.eup %719  ;;  %v488_v35 = vadd.f32 1.0, %v424_v27 }
  0xda   : > { %vm1052_vm7 = vcmp.lt.f32.partialorder %v467_v19, 0.0004427343  ;;  %v476_v38 = vand.u32 2147483647, %v422_v6  ;;  %v491_v39 = vmul.f32 -0.5, %v424_v27  ;;  %v484_v44 = vmul.f32 %v483_v25, %v1024_v40 }
  0xdb   : > { %v507_v31 = vsel %vm506_vm4, %v505_v13, %v433_v24  ;;  %v460_v33 = vsel %vm1045_vm5, %v457_v26, %v454_v23  ;;  %v481_v41 = vmul.f32 0.6931472, %v720_v57  ;;  %723 = vlog2.f32 %v488_v35 }
  0xdc   : > { %v510_v42 = vsel %vm509_vm6, %v508_v32, %v507_v31  ;;  %v722_v43 = vpop.eup %721  ;;  %v511_v45 = vrot.slane %v460_v33, 5  ;;  %v469_v46 = vsel %vm1052_vm7, %v466_v36, %v463_v28  ;;  %v475_v47 = vmul.f32 %v474_v34, %v422_v6 }
  0xdd   : > { %v472_v30 = vmul.f32 0.6931472, %v722_v43  ;;  %vm1060_vm9 = vcmp.lt.f32.partialorder %v485_v20, 0.0004427343  ;;  %vm477_vm11 = vcmp.lt.f32.partialorder %v476_v38, 0.0004427343 }
  0xde   : > { %v492_v49 = vadd.f32 1.0, %v491_v39  ;;  %v513_v50 = vsel %vm512_vm8, %v511_v45, %v510_v42  ;;  %v487_v40 = vsel %vm1060_vm9, %v484_v44, %v481_v41  ;;  %v494_v52 = vand.u32 2147483647, %v424_v27 }
  0xdf   : > { %v478_v51 = vsel %vm477_vm11, %v475_v47, %v472_v30  ;;  %v514_v53 = vrot.slane %v469_v46, 4  ;;  %v520_v61 = vrot.slane %v487_v40, 2 }
  0xe0   : > { %v517_v54 = vrot.slane %v478_v51, 3  ;;  %v493_v58 = vmul.f32 %v492_v49, %v424_v27  ;;  %vm495_vm14 = vcmp.lt.f32.partialorder %v494_v52, 0.0004427343 }
  0xe1   : > { %v724_v55 = vpop.eup %723  ;;  %v516_v56 = vsel %vm515_vm10, %v514_v53, %v513_v50 }
  0xe2   : > { %v490_v59 = vmul.f32 0.6931472, %v724_v55  ;;  %v519_v60 = vsel %vm518_vm12, %v517_v54, %v516_v56 }
  0xe3   : > { %v522_v63 = vsel %vm521_vm13, %v520_v61, %v519_v60 }
  0xe4   : > { %v496_v62 = vsel %vm495_vm14, %v493_v58, %v490_v59 }
  0xe5   : > { %v523_v0 = vrot.slane %v496_v62, 1 }
  0xe7   : > { %v525_v1 = vsel %vm524_vm15, %v523_v0, %v522_v63 }
  0xe8   : > { %527 = vst [vmem:[%s227_s19] sm:$0xff] %v525_v1 }
  0xe9   : > { %782 = shalt.err (!%p779_p8)
}
  0xea   : > { %657 = dma.vmem_to_hbm [thread:$0]  (%p902_p11), %s542_s6, 128, %s544_s10, %s529_s14  }
  0xeb PF: > { %s555_s8 = sand.u32 1, %s809_s15   ;;  %p664_p10 = pnand %p625_p9, %p906_p12 }
  0xec   : > { %s556_s30 = scalar_lea.sflag [#allocation4], %s555_s8 }
  0xed   : > { %p665_p1 = pneg %p664_p10 }
  0xef   : > { %804 = dma.done.wait (%p665_p1), %s556_s30, 128  }
  0xf0   : > { %806 = vsyncadd (%p665_p1), %s556_s30, 4294967168  ;;  %p17_p2 = scmp.ge.s32.totalorder %s877_s21, 4   ;;  %s1119_s15 = smov %s813_s16 }
  0xf1   : > { %s1120_s16 = smov %s817_s17  ;;  %s1121_s17 = smov %s889_s24 }
  0xf2   : > { %s1122_s18 = smov %s877_s21  ;;  %19 = sbr.rel (!%p17_p2) target bundleno = 5 (0x5), region = 84 }
  0xf7   :  { %562 = vsyncpa [#allocation3], 1 }
  0xf8   :  { %564 = vsyncpa [#allocation3 + $0x1], 1 }
  0xf9   :  { %565 = vsyncpa [#allocation4], 1 }
  0xfa   :  { %567 = vsyncpa [#allocation4 + $0x1], 1 }

// kernel: _splade_impl.1
= control target key start
LH: loop header
LB: loop body
LE: loop exit
PB: predicated region body
PF: predicated region fallthrough
CT: control target
= control target key end

     0   :  { %9 = vsyncpa [#allocation3], 0  ;;  %s1099_s0 = inlined_call_operand.vmem [shape: f32[64,32], index: 0, kind: input, shape index: {}]   ;;  %s1100_s1 = inlined_call_operand.hbm [shape: f32[32,256], index: 1, kind: input, shape index: {}]   ;;  %s1101_s2 = inlined_call_operand.vmem [shape: f32[1,256], index: 2, kind: input, shape index: {}]   ;;  %s1102_s3 = inlined_call_operand.vmem [shape: f32[64,1], index: 3, kind: input, shape index: {}]   ;;  %s1103_s4 = inlined_call_operand.hbm [shape: f32[8,256], index: 4, kind: output, shape index: {}]  }
   0x1   :  { %11 = vsyncpa [#allocation3 + $0x1], 0 }
   0x2   :  { %12 = vsyncpa [#allocation4], 0 }
   0x3   :  { %14 = vsyncpa [#allocation4 + $0x1], 0  ;;  %s852_s15 = smov 0   ;;  %s854_s16 = smov 0  }
   0x4   :  { %s856_s17 = smov 0   ;;  %s858_s18 = smov 0  }
   0x5 LB: > { %s873_s19 = sadd.s32 4294967295, %s821_s18   ;;  %s623_s20 = sadd.s32 4294967294, %s821_s18   ;;  %s821_s18 = sphi %s858_s18, %s1122_s18   ;;  %s817_s17 = sphi %s856_s17, %s1121_s17   ;;  %s813_s16 = sphi %s854_s16, %s1120_s16   ;;  %s809_s15 = sphi %s852_s15, %s1119_s15  }
   0x6   : > { %s877_s21 = sadd.s32 1, %s821_s18   ;;  %s48_s22 = sadd.s32 1, %s817_s17 }
   0x7   : > { %s45_s23 = ssub.s32 %s821_s18, %s877_s21  ;;  %p55_p0 = scmp.ne.s32.totalorder %s817_s17, %s813_s16 }
   0x8   : > { %p46_p1 = scmp.eq.s32.totalorder %s45_s23, 0  ;;  %p56_p2 = scmp.eq.s32.totalorder %s821_s18, 0 }
   0x9   : > { %p61_p3 = scmp.ne.s32.totalorder %s813_s16, %s809_s15  ;;  %p62_p4 = scmp.eq.s32.totalorder %s873_s19, 0 }
   0xa   : > { %s889_s24 = scalar_select %p46_p1, %s817_s17, %s48_s22  }
   0xb   : > { %p891_p5 = por %p56_p2, %p55_p0  ;;  %p895_p6 = por %p62_p4, %p61_p3 }
   0xc   : > { %p132_p7 = scmp.eq.s32.totalorder %s873_s19, 1  ;;  %p138_p8 = scmp.eq.s32.totalorder %s623_s20, 1 }
   0xd   : > { %p625_p9 = scmp.ge.s32.totalorder %s821_s18, 2  ;;  %p667_p10 = scmp.lt.s32.totalorder %s821_s18, 2 }
   0xe   : > { %p902_p11 = por %p132_p7, %p55_p0  ;;  %p906_p12 = por %p138_p8, %p61_p3 }
   0xf   : > { %s164_s29 = sand.u32 1, %s817_s17   ;;  %s627_s30 = sshll.u32 %s821_s18, 3 }
  0x10   : > { %s626_s5 = sshll.u32 %s164_s29, 5  ;;  %s172_s8 = scalar_lea.hbm %s1100_s1, %s627_s30 }
  0x11   : > { %s173_s9 = sshll.u32 %s172_s8, 4  ;;  %s168_s10 = scalar_lea.vmem [#allocation2], %s626_s5  ;;  %s174_s9 = int_to_ptr.hbm [resolvable:$true] %s173_s9 }
  0x12   : > { %s175_s11 = sshll.u32 %s168_s10, 4  ;;  %p917_p13 = pnand %p667_p10, %p891_p5  ;;  %s176_s11 = int_to_ptr.vmem [resolvable:$true] %s175_s11 }
  0x13   : > { %p628_p0 = scmp.ge.s32.totalorder %s821_s18, 1  ;;  %s165_s13 = scalar_lea.sflag [#allocation3], %s164_s29 }
  0x14   : > { %s725_s14 = sshra.s32 %s174_s9, 4  ;;  %p729_p2 = pneg %p917_p13  ;;  %s726_s14 = int_to_ptr.hbm [resolvable:$true] %s725_s14 }
  0x15   : > { %s727_s20 = scalar_lea.hbm %s726_s14, 32  ;;  %s732_s30 = scalar_lea.hbm %s1100_s1, 64 }
  0x16   : > { %p728_p1 = scmp.ne.s32.totalorder %s726_s14, %s727_s20  ;;  %p733_p5 = scmp.lt.s32.totalorder %s726_s14, %s1100_s1 }
  0x17   : > { %p734_p7 = scmp.lt.s32.totalorder %s732_s30, %s727_s20 }
  0x18   : > { %p730_p3 = pnand %p729_p2, %p728_p1 }
  0x19   : > { %p735_p8 = por %p734_p7, %p733_p5 }
  0x1a   : > { %p731_p4 = pneg %p730_p3 }
  0x1c   : > { %p736_p10 = pnand %p735_p8, %p731_p4 }
  0x1e   : > { %739 = shalt.err (!%p736_p10)
}
  0x1f   : > { %s823_s29 = smov 256   ;;  %s824_s6 = smov 128  }
  0x20   : > { %s825_s7 = smov 8   ;;  %p189_p1 = scmp.lt.s32.totalorder %s821_s18, 3 }
  0x21   : > { %662 = dma.hbm_to_vmem [thread:$0]  (!%p917_p13), %s174_s9, 512, %s176_s11, %s165_s13, %s823_s29, %s824_s6, %s825_s7  }
  0x22   : > { %p190_p2 = pnand %p628_p0, %p189_p1 }
  0x23   : > { %s936_s8 = sand.u32 (!%p190_p2), 1, %s813_s16  }
  0x24   : > { %193 = sbr.rel (%p190_p2) target bundleno = 235 (0xeb), region = 36  ;;  %s629_s10 = sshll.u32 (!%p190_p2), %s936_s8, 5 }
  0x25   : > { %s196_s14 = scalar_lea.sflag (!%p190_p2), [#allocation3], %s936_s8  ;;  %s199_s20 = scalar_lea.vmem (!%p190_p2), [#allocation2], %s629_s10 }
  0x29   : > { %800 = dma.done.wait (%p895_p6), %s196_s14, 512  }
  0x2a   : > { %802 = vsyncadd (%p895_p6), %s196_s14, 4294966784  ;;  %v826_v0 = vmov 0   ;;  %v242_v1 = vld [vmem:[%s199_s20 + $0x18] sm:$0xff]  ;;  %v244_v2 = vld [vmem:[%s1102_s3 + $0x8] sm:$0xff]  ;;  %p228_p6 = scmp.lt.s32.totalorder %s873_s19, 1  ;;  %vm291_vm0 = vcmask 261120  }
  0x2b   : > { %705 = vset.pattern.permute.xlu0 %v826_v0  ;;  %706 = vset.pattern.permute.xlu1 %v826_v0  ;;  %v243_v3 = vld [vmem:[%s1102_s3] sm:$0xff]  ;;  %v241_v4 = vld [vmem:[%s199_s20 + $0x10] sm:$0xff]  ;;  %v240_v5 = vld [vmem:[%s199_s20 + $0x8] sm:$0xff]  ;;  %vm506_vm4 = vcmask 1041409   ;;  %vm509_vm6 = vcmask 1042434   ;;  %vm512_vm8 = vcmask 1043459  }
  0x2c   : > { %707 = vset.pattern.permute.xlu2 %v826_v0  ;;  %328 = vmatpush.msra.mxu0 %v242_v1  ;;  %v239_v6 = vld [vmem:[%s199_s20] sm:$0xff]  ;;  %v233_v8 = vld [vmem:[%s1099_s0 + $0x10] sm:$0xff]  ;;  %s964_s7 = scalar_select %p228_p6, %s873_s19, 1  ;;  %v246_v12 = vld [vmem:[%s1102_s3 + $0x18] sm:$0xff]  ;;  %vm515_vm10 = vcmask 1044484   ;;  %vm518_vm12 = vcmask 1045509  }
  0x2d   : > { %643 = vmatpush.msra.mxu1 %v242_v1  ;;  %644 = vmatpush.msra.mxu2 %v242_v1  ;;  %v231_v7 = vld [vmem:[%s1099_s0] sm:$0xff]  ;;  %v237_v10 = vld [vmem:[%s1099_s0 + $0x30] sm:$0xff]  ;;  %v232_v14 = vld [vmem:[%s1099_s0 + $0x8] sm:$0xff]  ;;  %vm521_vm13 = vcmask 1046534   ;;  %vm524_vm15 = vcmask 1047559   ;;  %s529_s14 = scalar_lea.sflag [#allocation4], %s936_s8 }
  0x2e   : > { %645 = vmatpush.msra.mxu3 %v242_v1  ;;  %258 = vperm.xlu0 %705, %v244_v2   ;;  %v235_v9 = vld [vmem:[%s1099_s0 + $0x20] sm:$0xff]  ;;  %v245_v11 = vld [vmem:[%s1102_s3 + $0x10] sm:$0xff]  ;;  %s230_s22 = scalar_lea.vmem %s1101_s2, %s964_s7  ;;  %v234_v15 = vld [vmem:[%s1099_s0 + $0x18] sm:$0xff]  ;;  %s630_s7 = sshll.u32 %s936_s8, 3 }
  0x2f   : > { %253 = vperm.xlu1 %706, %v243_v3   ;;  %329 = vmatpush.msra.mxu0 %v241_v4  ;;  %v247_v13 = vld [vmem:[%s1102_s3 + $0x20] sm:$0xff]  ;;  %v236_v16 = vld [vmem:[%s1099_s0 + $0x28] sm:$0xff]  ;;  %v238_v17 = vld [vmem:[%s1099_s0 + $0x38] sm:$0xff]  ;;  %s775_s13 = scalar_lea.hbm %s1103_s4, 16 }
  0x30   : > { %646 = vmatpush.msra.mxu1 %v241_v4  ;;  %647 = vmatpush.msra.mxu2 %v241_v4  ;;  %v249_v18 = vld [vmem:[%s1102_s3 + $0x30] sm:$0xff]  ;;  %v250_v19 = vld [vmem:[%s1102_s3 + $0x38] sm:$0xff]  ;;  %v248_v20 = vld [vmem:[%s1102_s3 + $0x28] sm:$0xff] }
  0x31   : > { %648 = vmatpush.msra.mxu3 %v241_v4  ;;  %330 = vmatpush.msra.mxu0 %v240_v5  ;;  %v1013_v57 = vld [vmem:[%s230_s22] ss:$0 sm:$0xff]  ;;  %s640_s22 = sshll.u32 %s873_s19, 3  ;;  %s227_s19 = scalar_lea.vmem [#allocation5], %s630_s7 }
  0x32   : > { %649 = vmatpush.msra.mxu1 %v240_v5  ;;  %650 = vmatpush.msra.mxu2 %v240_v5  ;;  %s539_s29 = scalar_lea.hbm %s1103_s4, %s640_s22  ;;  %s541_s6 = sshll.u32 %s227_s19, 4  ;;  %s542_s6 = int_to_ptr.vmem [resolvable:$true] %s541_s6 }
  0x33   : > { %651 = vmatpush.msra.mxu3 %v240_v5  ;;  %331 = vmatpush.msra.mxu0 %v239_v6  ;;  %s543_s10 = sshll.u32 %s539_s29, 4  ;;  %s544_s10 = int_to_ptr.hbm [resolvable:$true] %s543_s10 }
  0x34   : > { %652 = vmatpush.msra.mxu1 %v239_v6  ;;  %653 = vmatpush.msra.mxu2 %v239_v6  ;;  %s769_s20 = sshra.s32 %s544_s10, 4  ;;  %s770_s20 = int_to_ptr.hbm [resolvable:$true] %s769_s20 }
  0x35   : > { %654 = vmatpush.msra.mxu3 %v239_v6  ;;  %631 = vmatmul.msk.f32.vlgmr.msra.gmra.mxu0 %vm291_vm0, %v231_v7  ;;  %s771_s9 = scalar_lea.hbm %s770_s20, 8  ;;  %p776_p4 = scmp.lt.s32.totalorder %s770_s20, %s1103_s4 }
  0x36   : > { %633 = vmatmul.msk.f32.vlgmr.msra.gmra.mxu1 %vm291_vm0, %v233_v8  ;;  %635 = vmatmul.msk.f32.vlgmr.msra.gmra.mxu2 %vm291_vm0, %v235_v9  ;;  %p772_p13 = scmp.ne.s32.totalorder %s770_s20, %s771_s9  ;;  %p777_p5 = scmp.lt.s32.totalorder %s775_s13, %s771_s9 }
  0x37   : > { %637 = vmatmul.msk.f32.vlgmr.msra.gmra.mxu3 %vm291_vm0, %v237_v10  ;;  %263 = vperm.xlu0 %705, %v245_v11  }
  0x38   : > { %268 = vperm.xlu1 %706, %v246_v12   ;;  %273 = vperm.xlu2 %707, %v247_v13   ;;  %p773_p0 = pnand %p772_p13, %p902_p11  ;;  %p778_p7 = por %p777_p5, %p776_p4 }
  0x3a   : > { %p774_p3 = pneg %p773_p0 }
  0x3c   : > { %p779_p8 = pnand %p778_p7, %p774_p3 }
  0x3d   : > { %632 = vmatmul.msk.f32.gmra.mxu0 %vm291_vm0, %v232_v14 }
  0x3e   : > { %634 = vmatmul.msk.f32.gmra.mxu1 %vm291_vm0, %v234_v15  ;;  %636 = vmatmul.msk.f32.gmra.mxu2 %vm291_vm0, %v236_v16 }
  0x3f   : > { %638 = vmatmul.msk.f32.gmra.mxu3 %vm291_vm0, %v238_v17  ;;  %283 = vperm.xlu0 %705, %v249_v18  }
  0x40   : > { %288 = vperm.xlu1 %706, %v250_v19   ;;  %278 = vperm.xlu2 %707, %v248_v20  }
  0x92   : > { %v274_v30 = vpop.permute.xlu2 %273 }
  0x9a   : > { %v279_v61 = vpop.permute.xlu2 %278 }
  0xa0   : > { %v259_v21 = vpop.permute.xlu0 %258 }
  0xa1   : > { %v254_v22 = vpop.permute.xlu1 %253 }
  0xa9   : > { %v264_v23 = vpop.permute.xlu0 %263 }
  0xaa   : > { %v269_v33 = vpop.permute.xlu1 %268 }
  0xb1   : > { %v284_v34 = vpop.permute.xlu0 %283 }
  0xb2   : > { %v333_v24 = vpop.f32.mrf.mxu0  ;;  %v289_v10 = vpop.permute.xlu1 %288 }
  0xb3   : > { %v339_v25 = vpop.f32.mrf.mxu1  ;;  %v334_v26 = vadd.f32 %v333_v24, %v254_v22 }
  0xb4   : > { %v340_v27 = vadd.f32 %v339_v25, %v264_v23 }
  0xb5   : > { %v357_v28 = vrot.slane %v334_v26, 4 }
  0xb6   : > { %v369_v29 = vrot.slane %v340_v27, 4 }
  0xb7   : > { %v358_v31 = vmax.f32 %v334_v26, %v357_v28 }
  0xb8   : > { %v370_v32 = vmax.f32 %v340_v27, %v369_v29 }
  0xb9   : > { %v359_v35 = vrot.slane %v358_v31, 2  ;;  %v345_v37 = vpop.f32.mrf.mxu2 }
  0xba   : > { %v371_v36 = vrot.slane %v370_v32, 2  ;;  %v351_v38 = vpop.f32.mrf.mxu3  ;;  %v346_v39 = vadd.f32 %v345_v37, %v274_v30  ;;  %v336_v41 = vpop.f32.mrf.mxu0 }
  0xbb   : > { %v352_v40 = vadd.f32 %v351_v38, %v284_v34  ;;  %v342_v42 = vpop.f32.mrf.mxu1  ;;  %v360_v43 = vmax.f32 %v358_v31, %v359_v35  ;;  %v337_v45 = vadd.f32 %v336_v41, %v259_v21 }
  0xbc   : > { %v372_v44 = vmax.f32 %v370_v32, %v371_v36  ;;  %v343_v46 = vadd.f32 %v342_v42, %v269_v33  ;;  %v381_v47 = vrot.slane %v346_v39, 4 }
  0xbd   : > { %v393_v48 = vrot.slane %v352_v40, 4  ;;  %v363_v50 = vrot.slane %v337_v45, 4  ;;  %v361_v52 = vrot.slane %v360_v43, 1 }
  0xbe   : > { %v373_v49 = vrot.slane %v372_v44, 1  ;;  %v375_v51 = vrot.slane %v343_v46, 4  ;;  %v382_v53 = vmax.f32 %v346_v39, %v381_v47 }
  0xbf   : > { %v394_v54 = vmax.f32 %v352_v40, %v393_v48  ;;  %v364_v55 = vmax.f32 %v337_v45, %v363_v50  ;;  %v362_v1 = vmax.f32 %v360_v43, %v361_v52 }
  0xc0   : > { %v376_v56 = vmax.f32 %v343_v46, %v375_v51  ;;  %v374_v58 = vmax.f32 %v372_v44, %v373_v49  ;;  %v383_v59 = vrot.slane %v382_v53, 2 }
  0xc1   : > { %v395_v60 = vrot.slane %v394_v54, 2  ;;  %v365_v62 = vrot.slane %v364_v55, 2  ;;  %v348_v0 = vpop.f32.mrf.mxu2  ;;  %v409_v11 = vadd.f32 %v1013_v57, %v362_v1 }
  0xc2   : > { %v377_v63 = vrot.slane %v376_v56, 2  ;;  %v384_v2 = vmax.f32 %v382_v53, %v383_v59  ;;  %v349_v4 = vadd.f32 %v348_v0, %v279_v61  ;;  %v411_v6 = vadd.f32 %v1013_v57, %v374_v58  ;;  %v354_v8 = vpop.f32.mrf.mxu3 }
  0xc3   : > { %v396_v3 = vmax.f32 %v394_v54, %v395_v60  ;;  %v366_v5 = vmax.f32 %v364_v55, %v365_v62  ;;  %v355_v16 = vadd.f32 %v354_v8, %v289_v10  ;;  %v417_v20 = vmax.f32 %v409_v11, 0.0 }
  0xc4   : > { %v385_v7 = vrot.slane %v384_v2, 1  ;;  %v378_v9 = vmax.f32 %v376_v56, %v377_v63  ;;  %v387_v14 = vrot.slane %v349_v4, 4  ;;  %v419_v17 = vmax.f32 %v411_v6, 0.0 }
  0xc5   : > { %v397_v13 = vrot.slane %v396_v3, 1  ;;  %v367_v15 = vrot.slane %v366_v5, 1  ;;  %v399_v25 = vrot.slane %v355_v16, 4  ;;  %v425_v29 = vadd.f32 1.0, %v417_v20 }
  0xc6   : > { %v386_v12 = vmax.f32 %v384_v2, %v385_v7  ;;  %v379_v19 = vrot.slane %v378_v9, 1  ;;  %v388_v23 = vmax.f32 %v349_v4, %v387_v14  ;;  %v443_v26 = vadd.f32 1.0, %v419_v17 }
  0xc7   : > { %v368_v18 = vmax.f32 %v366_v5, %v367_v15  ;;  %v398_v22 = vmax.f32 %v396_v3, %v397_v13  ;;  %v400_v34 = vmax.f32 %v355_v16, %v399_v25  ;;  %v428_v36 = vmul.f32 -0.5, %v417_v20 }
  0xc8   : > { %v413_v21 = vadd.f32 %v1013_v57, %v386_v12  ;;  %v380_v28 = vmax.f32 %v378_v9, %v379_v19  ;;  %v389_v32 = vrot.slane %v388_v23, 2  ;;  %709 = vlog2.f32 %v443_v26 }
  0xc9   : > { %v410_v24 = vadd.f32 %v1013_v57, %v368_v18  ;;  %v415_v31 = vadd.f32 %v1013_v57, %v398_v22  ;;  %v431_v37 = vand.u32 2147483647, %v417_v20  ;;  %v446_v42 = vmul.f32 -0.5, %v419_v17 }
  0xca   : > { %v1019_v30 = vmax.f32 %v413_v21, 0.0  ;;  %v412_v38 = vadd.f32 %v1013_v57, %v380_v28  ;;  %v390_v41 = vmax.f32 %v388_v23, %v389_v32  ;;  %v449_v43 = vand.u32 2147483647, %v419_v17 }
  0xcb   : > { %v418_v27 = vmax.f32 %v410_v24, 0.0  ;;  %v1024_v40 = vmax.f32 %v415_v31, 0.0  ;;  %v401_v45 = vrot.slane %v400_v34, 2  ;;  %v429_v48 = vadd.f32 1.0, %v428_v36 }
  0xcc   : > { %v461_v39 = vadd.f32 1.0, %v1019_v30  ;;  %v420_v44 = vmax.f32 %v412_v38, 0.0  ;;  %v391_v47 = vrot.slane %v390_v41, 1  ;;  %vm1026_vm1 = vcmp.lt.f32.partialorder %v431_v37, 0.0004427343 }
  0xcd   : > { %v434_v33 = vadd.f32 1.0, %v418_v27  ;;  %v437_v35 = vmul.f32 -0.5, %v418_v27  ;;  %v440_v49 = vand.u32 2147483647, %v418_v27  ;;  %v479_v53 = vadd.f32 1.0, %v1024_v40 }
  0xce   : > { %v452_v50 = vadd.f32 1.0, %v420_v44  ;;  %v710_v51 = vpop.eup %709  ;;  %v392_v54 = vmax.f32 %v390_v41, %v391_v47  ;;  %v402_v55 = vmax.f32 %v400_v34, %v401_v45  ;;  %v447_v58 = vadd.f32 1.0, %v446_v42 }
  0xcf   : > { %711 = vlog2.f32 %v434_v33  ;;  %v438_v46 = vadd.f32 1.0, %v437_v35  ;;  %vm1031_vm2 = vcmp.lt.f32.partialorder %v449_v43, 0.0004427343  ;;  %v455_v60 = vmul.f32 -0.5, %v420_v44 }
  0xd0   : > { %713 = vlog2.f32 %v425_v29  ;;  %v414_v0 = vadd.f32 %v1013_v57, %v392_v54  ;;  %v403_v1 = vrot.slane %v402_v55, 1  ;;  %v430_v2 = vmul.f32 %v429_v48, %v417_v20 }
  0xd1   : > { %715 = vlog2.f32 %v461_v39  ;;  %v439_v63 = vmul.f32 %v438_v46, %v418_v27  ;;  %v445_v3 = vmul.f32 0.6931472, %v710_v51  ;;  %v464_v4 = vmul.f32 -0.5, %v1019_v30 }
  0xd2   : > { %717 = vlog2.f32 %v452_v50  ;;  %vm441_vm3 = vcmp.lt.f32.partialorder %v440_v49, 0.0004427343  ;;  %v422_v6 = vmax.f32 %v414_v0, 0.0  ;;  %v404_v7 = vmax.f32 %v402_v55, %v403_v1 }
  0xd3   : > { %719 = vlog2.f32 %v479_v53  ;;  %v448_v9 = vmul.f32 %v447_v58, %v419_v17  ;;  %v482_v10 = vmul.f32 -0.5, %v1024_v40  ;;  %v456_v11 = vadd.f32 1.0, %v455_v60 }
  0xd4   : > { %v458_v14 = vand.u32 2147483647, %v420_v44  ;;  %v470_v15 = vadd.f32 1.0, %v422_v6  ;;  %v416_v16 = vadd.f32 %v1013_v57, %v404_v7  ;;  %v467_v19 = vand.u32 2147483647, %v1019_v30 }
  0xd5   : > { %v712_v56 = vpop.eup %711  ;;  %v485_v20 = vand.u32 2147483647, %v1024_v40  ;;  %v473_v21 = vmul.f32 -0.5, %v422_v6  ;;  %v451_v22 = vsel %vm1031_vm2, %v448_v9, %v445_v3  ;;  %v465_v17 = vadd.f32 1.0, %v464_v4 }
  0xd6   : > { %v714_v61 = vpop.eup %713  ;;  %v436_v62 = vmul.f32 0.6931472, %v712_v56  ;;  %721 = vlog2.f32 %v470_v15  ;;  %v483_v25 = vadd.f32 1.0, %v482_v10  ;;  %v457_v26 = vmul.f32 %v456_v11, %v420_v44 }
  0xd7   : > { %v427_v8 = vmul.f32 0.6931472, %v714_v61  ;;  %v716_v12 = vpop.eup %715  ;;  %v424_v27 = vmax.f32 %v416_v16, 0.0  ;;  %vm1045_vm5 = vcmp.lt.f32.partialorder %v458_v14, 0.0004427343  ;;  %v508_v32 = vrot.slane %v451_v22, 6 }
  0xd8   : > { %v442_v5 = vsel %vm441_vm3, %v439_v63, %v436_v62  ;;  %v718_v18 = vpop.eup %717  ;;  %v463_v28 = vmul.f32 0.6931472, %v716_v12  ;;  %v474_v34 = vadd.f32 1.0, %v473_v21  ;;  %v466_v36 = vmul.f32 %v465_v17, %v1019_v30 }
  0xd9   : > { %v505_v13 = vrot.slane %v442_v5, 7  ;;  %v454_v23 = vmul.f32 0.6931472, %v718_v18  ;;  %v433_v24 = vsel %vm1026_vm1, %v430_v2, %v427_v8  ;;  %v720_v57 = vpop.eup %719  ;;  %v488_v35 = vadd.f32 1.0, %v424_v27 }
  0xda   : > { %vm1052_vm7 = vcmp.lt.f32.partialorder %v467_v19, 0.0004427343  ;;  %v476_v38 = vand.u32 2147483647, %v422_v6  ;;  %v491_v39 = vmul.f32 -0.5, %v424_v27  ;;  %v484_v44 = vmul.f32 %v483_v25, %v1024_v40 }
  0xdb   : > { %v507_v31 = vsel %vm506_vm4, %v505_v13, %v433_v24  ;;  %v460_v33 = vsel %vm1045_vm5, %v457_v26, %v454_v23  ;;  %v481_v41 = vmul.f32 0.6931472, %v720_v57  ;;  %723 = vlog2.f32 %v488_v35 }
  0xdc   : > { %v510_v42 = vsel %vm509_vm6, %v508_v32, %v507_v31  ;;  %v722_v43 = vpop.eup %721  ;;  %v511_v45 = vrot.slane %v460_v33, 5  ;;  %v469_v46 = vsel %vm1052_vm7, %v466_v36, %v463_v28  ;;  %v475_v47 = vmul.f32 %v474_v34, %v422_v6 }
  0xdd   : > { %v472_v30 = vmul.f32 0.6931472, %v722_v43  ;;  %vm1060_vm9 = vcmp.lt.f32.partialorder %v485_v20, 0.0004427343  ;;  %vm477_vm11 = vcmp.lt.f32.partialorder %v476_v38, 0.0004427343 }
  0xde   : > { %v492_v49 = vadd.f32 1.0, %v491_v39  ;;  %v513_v50 = vsel %vm512_vm8, %v511_v45, %v510_v42  ;;  %v487_v40 = vsel %vm1060_vm9, %v484_v44, %v481_v41  ;;  %v494_v52 = vand.u32 2147483647, %v424_v27 }
  0xdf   : > { %v478_v51 = vsel %vm477_vm11, %v475_v47, %v472_v30  ;;  %v514_v53 = vrot.slane %v469_v46, 4  ;;  %v520_v61 = vrot.slane %v487_v40, 2 }
  0xe0   : > { %v517_v54 = vrot.slane %v478_v51, 3  ;;  %v493_v58 = vmul.f32 %v492_v49, %v424_v27  ;;  %vm495_vm14 = vcmp.lt.f32.partialorder %v494_v52, 0.0004427343 }
  0xe1   : > { %v724_v55 = vpop.eup %723  ;;  %v516_v56 = vsel %vm515_vm10, %v514_v53, %v513_v50 }
  0xe2   : > { %v490_v59 = vmul.f32 0.6931472, %v724_v55  ;;  %v519_v60 = vsel %vm518_vm12, %v517_v54, %v516_v56 }
  0xe3   : > { %v522_v63 = vsel %vm521_vm13, %v520_v61, %v519_v60 }
  0xe4   : > { %v496_v62 = vsel %vm495_vm14, %v493_v58, %v490_v59 }
  0xe5   : > { %v523_v0 = vrot.slane %v496_v62, 1 }
  0xe7   : > { %v525_v1 = vsel %vm524_vm15, %v523_v0, %v522_v63 }
  0xe8   : > { %527 = vst [vmem:[%s227_s19] sm:$0xff] %v525_v1 }
  0xe9   : > { %782 = shalt.err (!%p779_p8)
}
  0xea   : > { %657 = dma.vmem_to_hbm [thread:$0]  (%p902_p11), %s542_s6, 128, %s544_s10, %s529_s14  }
  0xeb PF: > { %s555_s8 = sand.u32 1, %s809_s15   ;;  %p664_p10 = pnand %p625_p9, %p906_p12 }
  0xec   : > { %s556_s30 = scalar_lea.sflag [#allocation4], %s555_s8 }
  0xed   : > { %p665_p1 = pneg %p664_p10 }
  0xef   : > { %804 = dma.done.wait (%p665_p1), %s556_s30, 128  }
  0xf0   : > { %806 = vsyncadd (%p665_p1), %s556_s30, 4294967168  ;;  %p17_p2 = scmp.ge.s32.totalorder %s877_s21, 4   ;;  %s1119_s15 = smov %s813_s16 }
  0xf1   : > { %s1120_s16 = smov %s817_s17  ;;  %s1121_s17 = smov %s889_s24 }
  0xf2   : > { %s1122_s18 = smov %s877_s21  ;;  %19 = sbr.rel (!%p17_p2) target bundleno = 5 (0x5), region = 84 }
  0xf7   :  { %562 = vsyncpa [#allocation3], 1 }
  0xf8   :  { %564 = vsyncpa [#allocation3 + $0x1], 1 }
  0xf9   :  { %565 = vsyncpa [#allocation4], 1 }
  0xfa   :  { %567 = vsyncpa [#allocation4 + $0x1], 1 }

</bundles_post_ra>
